<compile_context>
chip_gen: v7x
topology: tpu7x:2x2x1
jax: 0.10.0
libtpu: 0.0.40
codegen_flags: <defaults>
</compile_context>

<pallas_src>
import math

import jax
import jax.numpy as jnp
from jax.experimental import pallas as pl
from jax.experimental.pallas import tpu as pltpu


# Max number of L rows upcast to f32 / multiplied at once inside the kernel.
# Bounds the in-kernel f32 temporaries independently of the DMA block size.
_L_CHUNK = 256


# ----------------------------- kernels -----------------------------

def _scores_bl(hq_f32, enc_ref):
    """scores[b, l] = sum_h hq[b, h] * enc[l, b, h], f32, chunked over L.

    The multiply is done in f32 (v5e has no bf16 VPU/EUP and precision of the
    H-sum matters); chunking over L keeps the f32 cast + product temporaries
    bounded by (_L_CHUNK, TB, H) instead of the whole DMA block.
    """
    L = enc_ref.shape[0]
    chunks = []
    for l0 in range(0, L, _L_CHUNK):            # static (L is a compile-time int)
        tl = min(_L_CHUNK, L - l0)
        enc_c = enc_ref[pl.ds(l0, tl), :, :].astype(jnp.float32)      # (tl, TB, H)
        chunks.append(jnp.sum(enc_c * hq_f32[None, :, :], axis=-1))   # (tl, TB)
    scores_lb = chunks[0] if len(chunks) == 1 else jnp.concatenate(chunks, axis=0)
    return scores_lb.T                          # (TB, L): lane-dense for the output


def _softmax_rows(scores_bl):
    """Row softmax over the lane (L) axis; reciprocal on the EUP slot."""
    m = jnp.max(scores_bl, axis=-1, keepdims=True)
    e = jnp.exp(scores_bl - m)
    inv = pl.reciprocal(jnp.sum(e, axis=-1, keepdims=True), approx=True)
    return e * inv


def _general_attn_kernel(hidden_ref, enc_ref, w_ref, out_ref):
    """general: hq = hidden @ W (torch (out,in) weight => no transpose needed);
    the Linear bias is dropped — constant over L, cancels under the softmax."""
    hq = jnp.dot(hidden_ref[...], w_ref[...],
                 preferred_element_type=jnp.float32)       # (TB, H) f32 on the MXU
    out_ref[...] = _softmax_rows(_scores_bl(hq, enc_ref)).astype(out_ref.dtype)


def _dot_attn_kernel(hidden_ref, enc_ref, out_ref):
    """dot: score[b, l] = hidden[b] . enc[l, b]; softmax over L."""
    hq = hidden_ref[...].astype(jnp.float32)               # (TB, H)
    out_ref[...] = _softmax_rows(_scores_bl(hq, enc_ref)).astype(out_ref.dtype)


# ----------------------------- tiling helpers -----------------------------

def _round_up(x, m):
    return ((x + m - 1) // m) * m


def _sublane(itemsize):
    """Sub-32-bit dtypes pack along sublanes; TB is the sublane axis of the
    (L, TB, H) encoder block and the (TB, H)/(TB, L) blocks."""
    return {4: 8, 2: 16, 1: 32}.get(int(itemsize), 8)


def _vmem_limit_bytes():
    """Generation-aware scoped-VMEM request (v5e/v6e: 128 MiB phys, v7x: 64 MiB)."""
    try:
        phys = int(pltpu.get_tpu_info().vmem_capacity_bytes)
    except Exception:                       # conservative fallback (v7x per-TC)
        phys = 64 * 1024 * 1024
    return max(16 * 1024 * 1024, min((phys * 3) // 4, 96 * 1024 * 1024))


def _pick_batch_tile(B, L, H, in_itemsize, w_bytes, vmem_limit):
    """Batch tile TB: a multiple of the packed sublane count (or the full batch),
    sized so the double-buffered encoder DMA block *plus* the in-kernel f32
    temporaries stay inside the scoped-VMEM budget, and split so the grid has
    at least 2 (preferably 4, even-count) parallel steps when B allows."""
    sub = _sublane(in_itemsize)
    if B <= sub:
        return B                            # tiny batch: one full-B block

    l_tmp = min(L, _L_CHUNK)
    per_row = (2 * L * H * in_itemsize      # 2x double-buffered enc DMA block
               + 2 * l_tmp * H * 4          # f32 chunk temporaries (cast + product)
               + 4 * L * 4                  # f32 scores / softmax temps + out row
               + 2 * H * (in_itemsize + 4)) # hidden block (2x) + hq (f32)
    budget = (vmem_limit * 2) // 3 - 2 * w_bytes   # W is double-buffered by BlockSpec
    tb_vmem = max(sub, (max(budget, per_row) // per_row) // sub * sub)

    # Parallel-step heuristic: >= 2 steps, aim for 4 when B is large enough.
    target_steps = 4 if B >= 4 * sub else 2
    tb_split = max(sub, _round_up(-(-B // target_steps), sub))
    tb = min(tb_vmem, tb_split, _round_up(B, sub))

    # Prefer an even number of grid steps (v7x runs 2 TensorCores per chip),
    # but never shrink the tile below half its size to get there.
    steps = -(-B // tb)
    if steps > 1 and steps % 2 == 1:
        lo = max(sub, (tb // 2 // sub) * sub)
        for cand in range(tb - sub, lo - 1, -sub):
            if cand > 0 and (-(-B // cand)) % 2 == 0:
                return cand
    return tb


# ----------------------------- wrapper -----------------------------

def attention_forward(method, hidden, encoder_outputs, weight=None, bias=None,
                      batch_tile=None):
    """Pallas equivalent of Attention.forward.

    hidden:           (1, B, H)  decoder hidden state (PyTorch layout)
    encoder_outputs:  (L, B, H)  encoder outputs, consumed in native layout
    weight:           (H, H)     torch nn.Linear weight (out, in), method='general'
    bias:             (H,)       accepted for API parity; unused (cancels in softmax)
    returns:          (B, 1, L)  softmaxed attention weights (float32)
    """
    if method not in ("dot", "general"):
        raise ValueError(method, "is not an appropriate attention method")
    if method == "general" and weight is None:
        raise ValueError("method='general' requires the Linear weight")

    _, B, H = hidden.shape
    L = encoder_outputs.shape[0]
    in_itemsize = encoder_outputs.dtype.itemsize
    w_bytes = H * H * weight.dtype.itemsize if method == "general" else 0

    vmem_limit = _vmem_limit_bytes()
    if batch_tile is None:
        TB = _pick_batch_tile(B, L, H, in_itemsize, w_bytes, vmem_limit)
    else:
        # Validate / round a user-supplied tile: multiple of the sublane count
        # (block-shape divisibility on the TB axis) or the full batch.
        sub = _sublane(in_itemsize)
        TB = B if int(batch_tile) >= B else max(sub, (int(batch_tile) // sub) * sub)

    grid = (pl.cdiv(B, TB),)    # partial last block OK: OOB rows read padding,
                                # their garbage stays in-row, and writes are dropped
    h2 = hidden.reshape(B, H)   # drops the size-1 leading dim (metadata-only)

    out_shape = jax.ShapeDtypeStruct((B, L), jnp.float32)
    out_spec = pl.BlockSpec((TB, L), lambda i: (i, 0))
    hid_spec = pl.BlockSpec((TB, H), lambda i: (i, 0))
    enc_spec = pl.BlockSpec((L, TB, H), lambda i: (0, i, 0))
    cparams = pltpu.CompilerParams(
        dimension_semantics=("parallel",),      # shard batch tiles across TCs
        vmem_limit_bytes=vmem_limit,
    )
    # Advisory cost estimate: one HBM pass over the encoder slab dominates.
    flops = 2 * L * B * H + (2 * B * H * H if method == "general" else 0)
    bytes_accessed = (L * B * H * in_itemsize + B * H * hidden.dtype.itemsize
                      + w_bytes + B * L * 4)
    cost = pl.CostEstimate(flops=flops, transcendentals=B * L,
                           bytes_accessed=bytes_accessed)

    if method == "general":
        attn = pl.pallas_call(
            _general_attn_kernel,
            out_shape=out_shape,
            grid_spec=pl.GridSpec(
                grid=grid,
                in_specs=[hid_spec, enc_spec,
                          # W's index_map is constant; 2x W is reserved in the
                          # VMEM budget above.  TODO(synk): single-buffer W once
                          # pipeline_mode=pl.Buffered(1) is load-bearing here.
                          pl.BlockSpec((H, H), lambda i: (0, 0))],
                out_specs=out_spec,
            ),
            compiler_params=cparams,
            cost_estimate=cost,
        )(h2, encoder_outputs, weight)
    else:  # 'dot'
        attn = pl.pallas_call(
            _dot_attn_kernel,
            out_shape=out_shape,
            grid_spec=pl.GridSpec(
                grid=grid,
                in_specs=[hid_spec, enc_spec],
                out_specs=out_spec,
            ),
            compiler_params=cparams,
            cost_estimate=cost,
        )(h2, encoder_outputs)

    return attn[:, None, :]     # (B, 1, L): free metadata reshape


# ----------------------------- pure-JAX reference -----------------------------

def ref_attention(method, hidden, encoder_outputs, weight=None, bias=None):
    """Faithful transcription of the PyTorch forward (including the bias)."""
    if method == "general":
        energy = jnp.einsum("lbh,oh->lbo", encoder_outputs, weight) + bias
        scores = jnp.sum(hidden * energy, axis=2)             # (L, B)
    else:  # dot
        scores = jnp.sum(hidden * encoder_outputs, axis=2)    # (L, B)
    return jax.nn.softmax(scores.T, axis=1)[:, None, :]       # (B, 1, L)


if __name__ == "__main__":
    # Small shapes consistent with the module's forward: seq L=8, batch B=2, hidden H=32.
    L, B, H = 8, 2, 32

    key = jax.random.PRNGKey(0)
    k_h, k_e, k_w, k_b = jax.random.split(key, 4)

    hidden = jax.random.normal(k_h, (1, B, H), dtype=jnp.float32)
    encoder_outputs = jax.random.normal(k_e, (L, B, H), dtype=jnp.float32)

    # Deterministic nn.Linear(H, H) init (PyTorch-style uniform(-1/sqrt(H), 1/sqrt(H))).
    bound = 1.0 / math.sqrt(H)
    weight = jax.random.uniform(k_w, (H, H), minval=-bound, maxval=bound, dtype=jnp.float32)
    bias = jax.random.uniform(k_b, (H,), minval=-bound, maxval=bound, dtype=jnp.float32)

    # Tolerance accounts for the approx (EUP) reciprocal in the softmax epilogue and
    # the bias drop in 'general' (exactly softmax-invariant, not bit-identical in fp).
    tol = dict(atol=2e-3, rtol=2e-3)

    # method='general' (exercises the hidden-projection MXU path)
    out_general = jax.block_until_ready(
        attention_forward("general", hidden, encoder_outputs, weight, bias))
    ref_general = ref_attention("general", hidden, encoder_outputs, weight, bias)
    assert out_general.shape == (B, 1, L)
    assert jnp.allclose(out_general, ref_general, **tol)

    # method='dot'
    out_dot = jax.block_until_ready(attention_forward("dot", hidden, encoder_outputs))
    ref_dot = ref_attention("dot", hidden, encoder_outputs)
    assert out_dot.shape == (B, 1, L)
    assert jnp.allclose(out_dot, ref_dot, **tol)

    # Batch-tiled multi-step grid path (grid=(2,), "parallel" axis, explicit tile).
    B2 = 16
    k_h2, k_e2 = jax.random.split(jax.random.PRNGKey(1), 2)
    hidden2 = jax.random.normal(k_h2, (1, B2, H), dtype=jnp.float32)
    enc2 = jax.random.normal(k_e2, (L, B2, H), dtype=jnp.float32)
    out2 = jax.block_until_ready(
        attention_forward("general", hidden2, enc2, weight, bias, batch_tile=8))
    ref2 = ref_attention("general", hidden2, enc2, weight, bias)
    assert out2.shape == (B2, 1, L)
    assert jnp.allclose(out2, ref2, **tol)

    # Partial last batch tile (B=12, TB=8, grid=(2,)): OOB rows must not corrupt
    # the valid rows (reviewer correctness concern, asserted rather than assumed).
    B3 = 12
    k_h3, k_e3 = jax.random.split(jax.random.PRNGKey(2), 2)
    hidden3 = jax.random.normal(k_h3, (1, B3, H), dtype=jnp.float32)
    enc3 = jax.random.normal(k_e3, (L, B3, H), dtype=jnp.float32)
    out3 = jax.block_until_ready(
        attention_forward("dot", hidden3, enc3, batch_tile=8))
    ref3 = ref_attention("dot", hidden3, enc3)
    assert out3.shape == (B3, 1, L)
    assert jnp.allclose(out3, ref3, **tol)

    # Automatic tile picker (B=32 -> TB=8, 4 even parallel grid steps).
    B4 = 32
    k_h4, k_e4 = jax.random.split(jax.random.PRNGKey(3), 2)
    hidden4 = jax.random.normal(k_h4, (1, B4, H), dtype=jnp.float32)
    enc4 = jax.random.normal(k_e4, (L, B4, H), dtype=jnp.float32)
    out4 = jax.block_until_ready(
        attention_forward("general", hidden4, enc4, weight, bias))
    ref4 = ref_attention("general", hidden4, enc4, weight, bias)
    assert out4.shape == (B4, 1, L)
    assert jnp.allclose(out4, ref4, **tol)

    print("KERNEL_OK")
</pallas_src>

<mosaic_0001>
module attributes {stable_mosaic.version = 11 : i64} {
  func.func @_general_attn_kernel(%arg0: i32, %arg1: memref<2x32xf32, #tpu.memory_space<vmem>>, %arg2: memref<8x2x32xf32, #tpu.memory_space<vmem>>, %arg3: memref<32x32xf32, #tpu.memory_space<vmem>>, %arg4: memref<2x8xf32, #tpu.memory_space<vmem>>) attributes {dimension_semantics = [#tpu.dimension_semantics<parallel>], iteration_bounds = array<i64: 1>, scalar_prefetch = 0 : i64, scratch_operands = 0 : i64, tpu.core_type = #tpu.core_type<tc>, window_params = [{transform_indices = @transform_0, window_bounds = array<i64: 2, 32>}, {transform_indices = @transform_1, window_bounds = array<i64: 8, 2, 32>}, {pipeline_mode = #tpu.pipeline_mode<synchronous>, transform_indices = @transform_2, window_bounds = array<i64: 32, 32>}, {transform_indices = @transform_3, window_bounds = array<i64: 2, 8>}]} {
    %c0 = arith.constant 0 : index
    %c0_0 = arith.constant 0 : index
    %0 = vector.load %arg1[%c0, %c0_0] : memref<2x32xf32, #tpu.memory_space<vmem>>, vector<2x32xf32>
    %c0_1 = arith.constant 0 : index
    %c0_2 = arith.constant 0 : index
    %1 = vector.load %arg3[%c0_1, %c0_2] : memref<32x32xf32, #tpu.memory_space<vmem>>, vector<32x32xf32>
    %cst = arith.constant dense<0.000000e+00> : vector<2x32xf32>
    %2 = tpu.matmul %0, %1, %cst {dimension_numbers = #tpu.dot_dimension_numbers<[1], [0], [0], [1], [0, 0, 1, 1], [], []>} : vector<2x32xf32>, vector<32x32xf32>, vector<2x32xf32> -> vector<2x32xf32>
    %c0_3 = arith.constant 0 : index
    %c0_4 = arith.constant 0 : index
    %c0_5 = arith.constant 0 : index
    %3 = vector.load %arg2[%c0_3, %c0_4, %c0_5] : memref<8x2x32xf32, #tpu.memory_space<vmem>>, vector<8x2x32xf32>
    %4 = vector.shape_cast %2 : vector<2x32xf32> to vector<1x2x32xf32>
    %5 = vector.broadcast %4 : vector<1x2x32xf32> to vector<8x2x32xf32>
    %6 = arith.mulf %3, %5 : vector<8x2x32xf32>
    %cst_6 = arith.constant dense<0.000000e+00> : vector<8x2xf32>
    %7 = vector.multi_reduction <add>, %6, %cst_6 [2] : vector<8x2x32xf32> to vector<8x2xf32>
    %8 = tpu.transpose %7, [1, 0] : vector<8x2xf32> -> vector<2x8xf32>
    %cst_7 = arith.constant dense<0xFF800000> : vector<2xf32>
    %9 = vector.multi_reduction <maximumf>, %8, %cst_7 [1] : vector<2x8xf32> to vector<2xf32>
    %10 = vector.shape_cast %9 : vector<2xf32> to vector<2x1xf32>
    %11 = vector.broadcast %10 : vector<2x1xf32> to vector<2x8xf32>
    %12 = arith.subf %8, %11 : vector<2x8xf32>
    %13 = math.exp %12 : vector<2x8xf32>
    %cst_8 = arith.constant dense<0.000000e+00> : vector<2xf32>
    %14 = vector.multi_reduction <add>, %13, %cst_8 [1] : vector<2x8xf32> to vector<2xf32>
    %15 = vector.shape_cast %14 : vector<2xf32> to vector<2x1xf32>
    %16 = tpu.reciprocal %15 {approx = true} : vector<2x1xf32> -> vector<2x1xf32>
    %17 = vector.broadcast %16 : vector<2x1xf32> to vector<2x8xf32>
    %18 = arith.mulf %13, %17 : vector<2x8xf32>
    %c0_9 = arith.constant 0 : index
    %c0_10 = arith.constant 0 : index
    %19 = vector.load %arg4[%c0_9, %c0_10] : memref<2x8xf32, #tpu.memory_space<vmem>>, vector<2x8xf32>
    tpu.vector_store %arg4[%c0_9, %c0_10], %18 {strides = array<i32>} : memref<2x8xf32, #tpu.memory_space<vmem>>, vector<2x8xf32>,
    return
  }
  func.func @transform_0(%arg0: i32) -> (i32, i32) {
    %c0_i32 = arith.constant 0 : i32
    %c0_i32_0 = arith.constant 0 : i32
    return %arg0, %c0_i32 : i32, i32
  }
  func.func @transform_1(%arg0: i32) -> (i32, i32, i32) {
    %c0_i32 = arith.constant 0 : i32
    %c0_i32_0 = arith.constant 0 : i32
    %c0_i32_1 = arith.constant 0 : i32
    return %c0_i32, %arg0, %c0_i32_0 : i32, i32, i32
  }
  func.func @transform_2(%arg0: i32) -> (i32, i32) {
    %c0_i32 = arith.constant 0 : i32
    %c0_i32_0 = arith.constant 0 : i32
    %c0_i32_1 = arith.constant 0 : i32
    return %c0_i32, %c0_i32_0 : i32, i32
  }
  func.func @transform_3(%arg0: i32) -> (i32, i32) {
    %c0_i32 = arith.constant 0 : i32
    %c0_i32_0 = arith.constant 0 : i32
    return %arg0, %c0_i32 : i32, i32
  }
}

</mosaic_0001>

<bundles_post_ra>
// kernel: tpu_custom_call.1
= control target key start
LH: loop header
LB: loop body
LE: loop exit
PB: predicated region body
PF: predicated region fallthrough
CT: control target
= control target key end

     0   :  { %8 = vsyncpa [#allocation3], 0  ;;  %s514_s0 = inlined_call_operand.hbm [shape: f32[2,32], index: 0, kind: input, shape index: {}]   ;;  %s515_s1 = inlined_call_operand.hbm [shape: f32[8,2,32], index: 1, kind: input, shape index: {}]   ;;  %s516_s2 = inlined_call_operand.hbm [shape: f32[32,32], index: 2, kind: input, shape index: {}]   ;;  %s517_s3 = inlined_call_operand.hbm [shape: f32[2,8], index: 3, kind: output, shape index: {}]  }
   0x1   :  { %9 = vsyncpa [#allocation6], 0 }
   0x2   :  { %10 = vsyncpa [#allocation4], 0  ;;  %s424_s12 = smov [#allocation5]   ;;  %s330_s16 = scalar_lea.hbm %s515_s1, 256 }
   0x3   :  { %s26_s13 = sshll.u32 %s424_s12, 4  ;;  %p331_p0 = scmp.ne.s32.totalorder %s515_s1, %s330_s16  ;;  %s27_s13 = int_to_ptr.vmem [resolvable:$true] %s26_s13 }
   0x4   :  { %p334_p1 = scmp.lt.u32.totalorder %s330_s16, %s515_s1 }
   0x6   :  { %p336_p2 = pnand %p334_p1, %p331_p0 }
   0x8   :  { %339 = shalt.err (!%p336_p2)
}
   0x9   :  { %s340_s21 = scalar_lea.vmem %s27_s13, 256  ;;  %p345_p4 = scmp.lt.s32.totalorder %s27_s13, %s27_s13 }
   0xa   :  { %p341_p3 = scmp.ne.s32.totalorder %s27_s13, %s340_s21  ;;  %p346_p5 = scmp.lt.s32.totalorder %s340_s21, %s340_s21 }
   0xc   :  { %p347_p6 = por %p346_p5, %p345_p4 }
   0xe   :  { %p348_p7 = pnand %p347_p6, %p341_p3 }
  0x10   :  { %351 = shalt.err (!%p348_p7)
}
  0x11   :  { %s425_s22 = smov 32   ;;  %s426_s23 = smov 2  }
  0x12   :  { %32 = dma.hbm_to_vmem [thread:$0]  %s515_s1, 256, %s27_s13, [#allocation6], %s425_s22, %s425_s22, %s426_s23  }
  0x13   :  { %s427_s26 = smov [#allocation2]   ;;  %s428_s28 = smov [#allocation7]  }
  0x14   :  { %s17_s27 = sshll.u32 %s427_s26, 4  ;;  %s38_s29 = sshll.u32 %s428_s28, 4  ;;  %s18_s27 = int_to_ptr.vmem [resolvable:$true] %s17_s27  ;;  %s39_s29 = int_to_ptr.vmem [resolvable:$true] %s38_s29 }
  0x15   :  { %s352_s5 = scalar_lea.hbm %s514_s0, 32 }
  0x16   :  { %p353_p8 = scmp.ne.s32.totalorder %s514_s0, %s352_s5  ;;  %p356_p9 = scmp.lt.u32.totalorder %s352_s5, %s514_s0 }
  0x18   :  { %p358_p10 = pnand %p356_p9, %p353_p8 }
  0x1a   :  { %361 = shalt.err (!%p358_p10)
}
  0x1b   :  { %s362_s1 = scalar_lea.vmem %s18_s27, 32  ;;  %p367_p12 = scmp.lt.s32.totalorder %s18_s27, %s18_s27 }
  0x1c   :  { %p363_p11 = scmp.ne.s32.totalorder %s18_s27, %s362_s1  ;;  %p368_p13 = scmp.lt.s32.totalorder %s362_s1, %s362_s1 }
  0x1e   :  { %p369_p0 = por %p368_p13, %p367_p12 }
  0x20   :  { %p370_p1 = pnand %p369_p0, %p363_p11 }
  0x22   :  { %373 = shalt.err (!%p370_p1)
}
  0x23   :  { %20 = dma.hbm_to_vmem [thread:$0]  %s514_s0, 32, %s18_s27, [#allocation3]  }
  0x24   :  { %s374_s14 = scalar_lea.hbm %s516_s2, 512 }
  0x25   :  { %p375_p2 = scmp.ne.s32.totalorder %s516_s2, %s374_s14  ;;  %p378_p3 = scmp.lt.u32.totalorder %s374_s14, %s516_s2 }
  0x27   :  { %p380_p4 = pnand %p378_p3, %p375_p2 }
  0x29   :  { %383 = shalt.err (!%p380_p4)
}
  0x2a   :  { %s384_s19 = scalar_lea.vmem %s39_s29, 512  ;;  %p389_p6 = scmp.lt.s32.totalorder %s39_s29, %s39_s29 }
  0x2b   :  { %p385_p5 = scmp.ne.s32.totalorder %s39_s29, %s384_s19  ;;  %p390_p7 = scmp.lt.s32.totalorder %s384_s19, %s384_s19 }
  0x2d   :  { %p391_p8 = por %p390_p7, %p389_p6 }
  0x2f   :  { %p392_p9 = pnand %p391_p8, %p385_p5 }
  0x31   :  { %395 = shalt.err (!%p392_p9)
}
  0x32   :  { %s429_s0 = smov 128   ;;  %s430_s20 = smov 8  }
  0x33   :  { %44 = dma.hbm_to_vmem [thread:$0]  %s516_s2, 512, %s39_s29, [#allocation6], %s429_s0, %s429_s0, %s430_s20  }
  0x34   :  { %418 = dma.done.wait [#allocation3], 32  }
  0x35   :  { %419 = vsyncadd [#allocation3], 4294967264 }
  0x36   :  { %420 = dma.done.wait [#allocation6], 768  }
  0x37   :  { %421 = vsyncadd [#allocation6], 4294966528  ;;  %v431_v0 = vmov 0.0|0.0   ;;  %vm432_vm0 = vmmov 0   ;;  %v433_v1 = vmov 0.0   ;;  %v55_v2 = vld [vmem:[#allocation7] sm:$0xff]  ;;  %v182_v35 = vlaneseq }
  0x38   :  { %309 = vmatprep.subr.bf16.mxu0 %v431_v0  ;;  %306 = vmatprep.mubr.msk.f32.mxu0 %vm432_vm0, %v433_v1  ;;  %v56_v3 = vld [vmem:[#allocation7 + $0x8] sm:$0xff]  ;;  %v57_v4 = vld [vmem:[#allocation7 + $0x10] sm:$0xff]  ;;  %v58_v6 = vld [vmem:[#allocation7 + $0x18] sm:$0xff]  ;;  %vm59_vm1 = vcmask 261120   ;;  %vm149_vm2 = vcmask 254976   ;;  %vm216_vm3 = vcmask 1041409  }
  0x39   :  { %v310_v5 = vpack.c.bf16 %v56_v3, %v55_v2  ;;  %v313_v7 = vpack.c.bf16 %v58_v6, %v57_v4  ;;  %v54_v8 = vld [vmem:[#allocation2] sm:$0x3]  ;;  %v135_v9 = vld [vmem:[#allocation5 + $0x4] sm:$0x3]  ;;  %v133_v10 = vld [vmem:[#allocation5] sm:$0x3] }
  0x3a   :  { %v136_v12 = vld [vmem:[#allocation5 + $0x6] sm:$0x3]  ;;  %v134_v13 = vld [vmem:[#allocation5 + $0x2] sm:$0x3]  ;;  %v138_v21 = vld [vmem:[#allocation5 + $0xa] sm:$0x3] }
  0x3b   :  { %311 = vmatpush3.bf16.msra.mxu0 %v310_v5  ;;  %v137_v22 = vld [vmem:[#allocation5 + $0x8] sm:$0x3]  ;;  %v140_v27 = vld [vmem:[#allocation5 + $0xe] sm:$0x3]  ;;  %v139_v28 = vld [vmem:[#allocation5 + $0xc] sm:$0x3] }
  0x3c   :  { %312 = vmatprep.subr.bf16.mxu0 %v431_v0  ;;  %v183_v36 = vand.u32 127, %v182_v35  ;;  %v185_v37 = vshrl.u32 %v182_v35, 7  ;;  %vm218_vm4 = vcmask 1042434   ;;  %vm220_vm5 = vcmask 1043459   ;;  %s434_s2 = smov [#allocation8]  }
  0x3d   :  { %vm222_vm6 = vcmask 1044484   ;;  %vm224_vm7 = vcmask 1045509   ;;  %vm226_vm8 = vcmask 1046534   ;;  %vm228_vm9 = vcmask 1047559   ;;  %s282_s23 = sshll.u32 %s434_s2, 4  ;;  %s283_s23 = int_to_ptr.vmem [resolvable:$true] %s282_s23 }
  0x3e   :  { %v186_v40 = vsub.s32 %v183_v36, %v185_v37  ;;  %vm263_vm10 = vcmask 58368   ;;  %s396_s24 = scalar_lea.vmem %s283_s23, 32  ;;  %p401_p11 = scmp.lt.s32.totalorder %s283_s23, %s283_s23 }
  0x3f   :  { %314 = vmatpush3.bf16.msra.mxu0 %v313_v7  ;;  %p397_p10 = scmp.ne.s32.totalorder %s283_s23, %s396_s24  ;;  %p402_p12 = scmp.lt.s32.totalorder %s396_s24, %s396_s24 }
  0x41   :  { %p403_p13 = por %p402_p12, %p401_p11 }
  0x42   :  { %307 = vmatmul.mubr.msk.f32.vlgmr.msra.gmra.mrb[0].mxu0 %vm59_vm1, %v54_v8 }
  0x43   :  { %p404_p0 = pnand %p403_p13, %p397_p10 }
 0x115   :  { %v129_v11 = vpop.f32.mrb[0].mxu0 }
 0x116   :  { %v308_v14 = vpop.f32.mrb[1].mxu0  ;;  %v143_v15 = vmul.f32 %v135_v9, %v129_v11  ;;  %v141_v16 = vmul.f32 %v133_v10, %v129_v11  ;;  %v144_v19 = vmul.f32 %v136_v12, %v129_v11  ;;  %v142_v20 = vmul.f32 %v134_v13, %v129_v11 }
 0x117   :  { %v146_v25 = vmul.f32 %v138_v21, %v129_v11  ;;  %v145_v26 = vmul.f32 %v137_v22, %v129_v11  ;;  %v148_v31 = vmul.f32 %v140_v27, %v129_v11  ;;  %v147_v32 = vmul.f32 %v139_v28, %v129_v11 }
 0x118   :  { %v156_v17 = vsel %vm149_vm2, %v143_v15, 0.0  ;;  %v150_v18 = vsel %vm149_vm2, %v141_v16, 0.0  ;;  %v159_v23 = vsel %vm149_vm2, %v144_v19, 0.0  ;;  %v153_v24 = vsel %vm149_vm2, %v142_v20, 0.0 }
 0x119   :  { %157 = vadd.xlane.f32.xlu1 %v156_v17  ;;  %151 = vadd.xlane.f32.xlu0 %v150_v18  ;;  %v165_v29 = vsel %vm149_vm2, %v146_v25, 0.0  ;;  %v162_v30 = vsel %vm149_vm2, %v145_v26, 0.0  ;;  %v171_v33 = vsel %vm149_vm2, %v148_v31, 0.0  ;;  %v168_v34 = vsel %vm149_vm2, %v147_v32, 0.0 }
 0x11d   :  { %160 = vadd.xlane.f32.xlu1 %v159_v23  ;;  %154 = vadd.xlane.f32.xlu0 %v153_v24 }
 0x121   :  { %166 = vadd.xlane.f32.xlu1 %v165_v29  ;;  %163 = vadd.xlane.f32.xlu0 %v162_v30 }
 0x125   :  { %172 = vadd.xlane.f32.xlu1 %v171_v33  ;;  %169 = vadd.xlane.f32.xlu0 %v168_v34 }
 0x1a6   :  { %v158_v38 = vpop.xlane.xlu1 %157  ;;  %v152_v39 = vpop.xlane.xlu0 %151 }
 0x1a7   :  { %v187_v43 = vrot.slane %v152_v39, %v186_v40  ;;  %v195_v45 = vrot.slane %v158_v38, %v186_v40 }
 0x1aa   :  { %v161_v41 = vpop.xlane.xlu1 %160  ;;  %v155_v42 = vpop.xlane.xlu0 %154 }
 0x1ab   :  { %v191_v44 = vrot.slane %v155_v42, %v186_v40  ;;  %v199_v46 = vrot.slane %v161_v41, %v186_v40 }
 0x1ad   :  { %v217_v47 = vsel %vm216_vm3, %v191_v44, %v187_v43 }
 0x1ae   :  { %v219_v48 = vsel %vm218_vm4, %v195_v45, %v217_v47  ;;  %v167_v49 = vpop.xlane.xlu1 %166  ;;  %v164_v50 = vpop.xlane.xlu0 %163 }
 0x1af   :  { %v221_v51 = vsel %vm220_vm5, %v199_v46, %v219_v48  ;;  %v203_v52 = vrot.slane %v164_v50, %v186_v40  ;;  %v207_v53 = vrot.slane %v167_v49, %v186_v40 }
 0x1b1   :  { %v223_v54 = vsel %vm222_vm6, %v203_v52, %v221_v51 }
 0x1b2   :  { %v173_v55 = vpop.xlane.xlu1 %172  ;;  %v170_v56 = vpop.xlane.xlu0 %169  ;;  %v225_v59 = vsel %vm224_vm7, %v207_v53, %v223_v54 }
 0x1b3   :  { %v215_v57 = vrot.slane %v173_v55, %v186_v40  ;;  %v211_v58 = vrot.slane %v170_v56, %v186_v40 }
 0x1b5   :  { %v227_v60 = vsel %vm226_vm8, %v211_v58, %v225_v59 }
 0x1b6   :  { %v229_v61 = vsel %vm228_vm9, %v215_v57, %v227_v60 }
 0x1b7   :  { %231 = vxpose.xlu0.b32.start.end [1/1] (short) (narrow) %v229_v61, 8 }
 0x237   :  { %v247_v62 = vpop.trf.xlu0 }
 0x238   :  { %v264_v63 = vsel %vm263_vm10, %v247_v62, -inf }
 0x239   :  { %265 = vmax.xlane.f32.xlu1 %v264_v63 }
 0x2c6   :  { %v266_v0 = vpop.xlane.xlu1 %265 }
 0x2c7   :  { %v267_v1 = vsub.f32 %v247_v62, %v266_v0 }
 0x2c9   :  { %v268_v2 = vmul.f32 1.442695, %v267_v1 }
 0x2cb   :  { %326 = vpow2.f32 %v268_v2 }
 0x2d5   :  { %v327_v3 = vpop.eup %326 }
 0x2d6   :  { %v270_v4 = vsel %vm263_vm10, %v327_v3, 0.0 }
 0x2d7   :  { %271 = vadd.xlane.f32.xlu1 %v270_v4 }
 0x364   :  { %v272_v5 = vpop.xlane.xlu1 %271 }
 0x365   :  { %328 = vrcp.f32 %v272_v5 }
 0x36f   :  { %v329_v6 = vpop.eup %328 }
 0x370   :  { %v274_v7 = vmul.f32 %v329_v6, %v327_v3 }
 0x372   :  { %275 = vst.msk [vmem:[#allocation8] sm:$0x3] %vm263_vm10, %v274_v7 }
 0x373   :  { %407 = shalt.err (!%p404_p0)
}
 0x374   :  { %s408_s27 = scalar_lea.hbm %s517_s3, 32 }
 0x375   :  { %p409_p1 = scmp.ne.s32.totalorder %s517_s3, %s408_s27  ;;  %p412_p2 = scmp.lt.u32.totalorder %s408_s27, %s517_s3 }
 0x377   :  { %p414_p3 = pnand %p412_p2, %p409_p1 }
 0x379   :  { %417 = shalt.err (!%p414_p3)
}
 0x37a   :  { %285 = dma.vmem_to_hbm [thread:$0]  %s283_s23, 32, %s517_s3, [#allocation4]  }
 0x37b   :  { %422 = dma.done.wait [#allocation4], 32  }
 0x37c   :  { %423 = vsyncadd [#allocation4], 4294967264 }
 0x37d   :  { %289 = vsyncpa [#allocation3], 1 }
 0x37e   :  { %290 = vsyncpa [#allocation6], 1 }
 0x37f   :  { %291 = vsyncpa [#allocation4], 1 }

</bundles_post_ra>
